<compile_context>
chip_gen: v5e
topology: v5e:2x2
jax: 0.10.0
libtpu: 0.0.40
codegen_flags: <defaults>
</compile_context>

<pallas_src>
import functools

import jax
import jax.numpy as jnp
from jax.experimental import pallas as pl
from jax.experimental.pallas import tpu as pltpu

LN_EPS = 1e-5          # nn.LayerNorm default eps
LEAKY_SLOPE = 0.2      # nn.LeakyReLU(0.2)


def _choose_batch_tile(B, target_tb=512):
    """Pick (tile_rows, grid_steps) for the batch dimension.

    * tiles near `target_tb` rows (raise target_tb further on v7x, where the
      fixed ~0.35 us/step overhead dominates sooner with 3.2 TB/s HBM);
    * at least 2 grid steps whenever B >= 16 so the "parallel" grid axis can
      use both v7x TensorCores;
    * tiles are multiples of 8 rows (sublane-aligned); the final tile may run
      past B - Pallas masks the out-of-bounds rows, so padding waste is < 8
      rows instead of < TB rows.
    """
    if B <= 8:
        return B, 1                       # block dim == full array dim (legal)
    n_units = pl.cdiv(B, 8)               # number of 8-row sublane groups
    units_per_tile = max(1, min(target_tb // 8, (n_units + 1) // 2))
    tb = units_per_tile * 8
    return tb, pl.cdiv(B, tb)


def _make_stack_kernel(n_layers):
    """Fused kernel for the whole Linear->LayerNorm->LeakyReLU(->Dropout) stack.

    Signature: (x_ref, w0,b0,g0,beta0, w1,b1,g1,beta1, ..., o_ref).
    Intermediate activations live in vregs/VMEM; only x and the final output
    ever touch HBM.
    """
    def kernel(x_ref, *refs):
        o_ref = refs[-1]
        param_refs = refs[:-1]

        h = x_ref[...]
        for li in range(n_layers):
            w_ref, b_ref, g_ref, bt_ref = param_refs[4 * li:4 * li + 4]

            # Linear on the MXU: bf16 operands, f32 accumulation.
            y = jnp.dot(h.astype(w_ref.dtype), w_ref[...],
                        preferred_element_type=jnp.float32) + b_ref[...]

            # LayerNorm statistics in f32 over the true feature width
            # (no padding anywhere -> no lane mask needed).
            mean = jnp.mean(y, axis=-1, keepdims=True)
            centered = y - mean
            var = jnp.mean(centered * centered, axis=-1, keepdims=True)
            y_norm = centered * jax.lax.rsqrt(var + LN_EPS) * g_ref[...] + bt_ref[...]

            # LeakyReLU(0.2).
            h = jnp.where(y_norm >= 0, y_norm, LEAKY_SLOPE * y_norm)
            # Dropout(0.2): identity in eval mode.
            # TODO(synk): training-mode dropout (random mask + 1/(1-p) scale).

        o_ref[...] = h.astype(o_ref.dtype)

    return kernel


def init_condition_decoder_params(key, layers):
    """Deterministic synthetic parameters matching nn.Linear / nn.LayerNorm shapes (f32)."""
    params = []
    for i in range(len(layers) - 1):
        d_in, d_out = layers[i], layers[i + 1]
        key, kw, kb, kg, kbt = jax.random.split(key, 5)
        bound = 1.0 / (d_in ** 0.5)  # PyTorch Linear default init range
        w = jax.random.uniform(kw, (d_in, d_out), jnp.float32, -bound, bound)  # = weight.T
        b = jax.random.uniform(kb, (1, d_out), jnp.float32, -bound, bound)
        # LayerNorm defaults are ones/zeros; perturb slightly so they matter.
        gamma = 1.0 + 0.1 * jax.random.normal(kg, (1, d_out), jnp.float32)
        beta = 0.1 * jax.random.normal(kbt, (1, d_out), jnp.float32)
        params.append((w, b, gamma, beta))
    return params


def prepare_decoder_params(params, weight_dtype=jnp.bfloat16):
    """ONE-TIME prep outside the per-call jitted path.

    Weights -> bf16 (halved HBM reads, native MXU rate); bias/gamma/beta stay
    f32 ((1, d_out) shaped) since all LayerNorm math is done in f32.
    No zero-padding: every BlockSpec uses the true feature width.
    """
    flat = []
    for (w, b, gamma, beta) in params:
        flat += [jnp.asarray(w, weight_dtype),
                 jnp.asarray(b, jnp.float32).reshape(1, -1),
                 jnp.asarray(gamma, jnp.float32).reshape(1, -1),
                 jnp.asarray(beta, jnp.float32).reshape(1, -1)]
    return tuple(flat)


@functools.partial(jax.jit, static_argnames=("layers",))
def condition_decoder_forward(x, flat_params, layers):
    """Apply the full ConditionDecoder stack with a single fused pallas_call.

    x: (B, layers[0]); preferably bf16 so the HBM input stream is halved.
    flat_params: output of prepare_decoder_params (bf16 weights, f32 LN params).
    """
    layers = tuple(int(d) for d in layers)
    n_layers = len(layers) - 1
    B, d_in = x.shape
    assert d_in == layers[0], (d_in, layers)
    d_out = layers[-1]

    TB, steps = _choose_batch_tile(B)

    in_specs = [pl.BlockSpec((TB, d_in), lambda i: (i, 0))]
    for li in range(n_layers):
        di, do = layers[li], layers[li + 1]
        # Weights / LN params are grid-resident (constant index_map). If layer
        # widths ever grow into the 2k-4k range, add pipeline_mode=pl.Buffered(1)
        # here to drop their double buffers (matters for v7x's 64 MiB VMEM);
        # at these feature widths it is irrelevant.
        in_specs += [
            pl.BlockSpec((di, do), lambda i: (0, 0)),   # W (= weight.T), resident
            pl.BlockSpec((1, do), lambda i: (0, 0)),    # bias
            pl.BlockSpec((1, do), lambda i: (0, 0)),    # gamma
            pl.BlockSpec((1, do), lambda i: (0, 0)),    # beta
        ]

    kernel = _make_stack_kernel(n_layers)

    return pl.pallas_call(
        kernel,
        out_shape=jax.ShapeDtypeStruct((B, d_out), x.dtype),
        grid=(steps,),
        in_specs=in_specs,
        out_specs=pl.BlockSpec((TB, d_out), lambda i: (i, 0)),
        compiler_params=pltpu.CompilerParams(
            # Batch tiles are independent -> shard the grid across v7x's 2 TCs.
            dimension_semantics=("parallel",),
        ),
    )(x, *flat_params)


def _reference_forward(x, params):
    """Pure-JAX f32 reference (matches PyTorch eval-mode forward)."""
    for (w, b, gamma, beta) in params:
        y = x @ w + b
        mean = jnp.mean(y, axis=-1, keepdims=True)
        var = jnp.mean((y - mean) ** 2, axis=-1, keepdims=True)
        yn = (y - mean) / jnp.sqrt(var + LN_EPS) * gamma + beta
        x = jnp.where(yn >= 0, yn, LEAKY_SLOPE * yn)
    return x


if __name__ == "__main__":
    layers = (16, 32, 64)   # ConditionDecoder(layers=[16, 32, 64])
    batch = 8

    key = jax.random.PRNGKey(0)
    key, kx = jax.random.split(key)
    x_f32 = jax.random.normal(kx, (batch, layers[0]), jnp.float32)
    x = x_f32.astype(jnp.bfloat16)          # bf16 HBM input stream

    params = init_condition_decoder_params(key, list(layers))
    flat_params = prepare_decoder_params(params)   # once, outside the jit path

    out = condition_decoder_forward(x, flat_params, layers)
    out = jax.block_until_ready(out)

    ref = _reference_forward(x_f32, params)
    assert out.shape == (batch, layers[-1])
    assert jnp.allclose(out.astype(jnp.float32), ref, atol=5e-2, rtol=5e-2), \
        "Pallas output mismatch vs reference"

    print("KERNEL_OK")
</pallas_src>

<mosaic_0001>
module attributes {stable_mosaic.version = 11 : i64} {
  func.func @kernel(%arg0: i32, %arg1: memref<8x16xbf16, #tpu.memory_space<vmem>>, %arg2: memref<16x32xbf16, #tpu.memory_space<vmem>>, %arg3: memref<1x32xf32, #tpu.memory_space<vmem>>, %arg4: memref<1x32xf32, #tpu.memory_space<vmem>>, %arg5: memref<1x32xf32, #tpu.memory_space<vmem>>, %arg6: memref<32x64xbf16, #tpu.memory_space<vmem>>, %arg7: memref<1x64xf32, #tpu.memory_space<vmem>>, %arg8: memref<1x64xf32, #tpu.memory_space<vmem>>, %arg9: memref<1x64xf32, #tpu.memory_space<vmem>>, %arg10: memref<8x64xbf16, #tpu.memory_space<vmem>>) attributes {dimension_semantics = [#tpu.dimension_semantics<parallel>], iteration_bounds = array<i64: 1>, scalar_prefetch = 0 : i64, scratch_operands = 0 : i64, tpu.core_type = #tpu.core_type<tc>, window_params = [{transform_indices = @transform_0, window_bounds = array<i64: 8, 16>}, {pipeline_mode = #tpu.pipeline_mode<synchronous>, transform_indices = @transform_1, window_bounds = array<i64: 16, 32>}, {pipeline_mode = #tpu.pipeline_mode<synchronous>, transform_indices = @transform_2, window_bounds = array<i64: 1, 32>}, {pipeline_mode = #tpu.pipeline_mode<synchronous>, transform_indices = @transform_3, window_bounds = array<i64: 1, 32>}, {pipeline_mode = #tpu.pipeline_mode<synchronous>, transform_indices = @transform_4, window_bounds = array<i64: 1, 32>}, {pipeline_mode = #tpu.pipeline_mode<synchronous>, transform_indices = @transform_5, window_bounds = array<i64: 32, 64>}, {pipeline_mode = #tpu.pipeline_mode<synchronous>, transform_indices = @transform_6, window_bounds = array<i64: 1, 64>}, {pipeline_mode = #tpu.pipeline_mode<synchronous>, transform_indices = @transform_7, window_bounds = array<i64: 1, 64>}, {pipeline_mode = #tpu.pipeline_mode<synchronous>, transform_indices = @transform_8, window_bounds = array<i64: 1, 64>}, {transform_indices = @transform_9, window_bounds = array<i64: 8, 64>}]} {
    %c0 = arith.constant 0 : index
    %c0_0 = arith.constant 0 : index
    %0 = vector.load %arg1[%c0, %c0_0] : memref<8x16xbf16, #tpu.memory_space<vmem>>, vector<8x16xbf16>
    %c0_1 = arith.constant 0 : index
    %c0_2 = arith.constant 0 : index
    %1 = vector.load %arg2[%c0_1, %c0_2] : memref<16x32xbf16, #tpu.memory_space<vmem>>, vector<16x32xbf16>
    %cst = arith.constant dense<0.000000e+00> : vector<8x32xf32>
    %2 = tpu.matmul %0, %1, %cst {dimension_numbers = #tpu.dot_dimension_numbers<[1], [0], [0], [1], [0, 0, 1, 1], [], []>} : vector<8x16xbf16>, vector<16x32xbf16>, vector<8x32xf32> -> vector<8x32xf32>
    %c0_3 = arith.constant 0 : index
    %c0_4 = arith.constant 0 : index
    %3 = vector.load %arg3[%c0_3, %c0_4] : memref<1x32xf32, #tpu.memory_space<vmem>>, vector<1x32xf32>
    %4 = vector.broadcast %3 : vector<1x32xf32> to vector<8x32xf32>
    %5 = arith.addf %2, %4 : vector<8x32xf32>
    %cst_5 = arith.constant dense<0.000000e+00> : vector<8xf32>
    %6 = vector.multi_reduction <add>, %5, %cst_5 [1] : vector<8x32xf32> to vector<8xf32>
    %7 = vector.shape_cast %6 : vector<8xf32> to vector<8x1xf32>
    %cst_6 = arith.constant 3.200000e+01 : f32
    %8 = vector.broadcast %cst_6 : f32 to vector<8x1xf32>
    %9 = arith.divf %7, %8 : vector<8x1xf32>
    %10 = vector.broadcast %9 : vector<8x1xf32> to vector<8x32xf32>
    %11 = arith.subf %5, %10 : vector<8x32xf32>
    %12 = arith.mulf %11, %11 : vector<8x32xf32>
    %cst_7 = arith.constant dense<0.000000e+00> : vector<8xf32>
    %13 = vector.multi_reduction <add>, %12, %cst_7 [1] : vector<8x32xf32> to vector<8xf32>
    %14 = vector.shape_cast %13 : vector<8xf32> to vector<8x1xf32>
    %cst_8 = arith.constant 3.200000e+01 : f32
    %15 = vector.broadcast %cst_8 : f32 to vector<8x1xf32>
    %16 = arith.divf %14, %15 : vector<8x1xf32>
    %cst_9 = arith.constant 9.99999974E-6 : f32
    %17 = vector.broadcast %cst_9 : f32 to vector<8x1xf32>
    %18 = arith.addf %16, %17 : vector<8x1xf32>
    %19 = math.rsqrt %18 : vector<8x1xf32>
    %20 = vector.broadcast %19 : vector<8x1xf32> to vector<8x32xf32>
    %21 = arith.mulf %11, %20 : vector<8x32xf32>
    %c0_10 = arith.constant 0 : index
    %c0_11 = arith.constant 0 : index
    %22 = vector.load %arg4[%c0_10, %c0_11] : memref<1x32xf32, #tpu.memory_space<vmem>>, vector<1x32xf32>
    %23 = vector.broadcast %22 : vector<1x32xf32> to vector<8x32xf32>
    %24 = arith.mulf %21, %23 : vector<8x32xf32>
    %c0_12 = arith.constant 0 : index
    %c0_13 = arith.constant 0 : index
    %25 = vector.load %arg5[%c0_12, %c0_13] : memref<1x32xf32, #tpu.memory_space<vmem>>, vector<1x32xf32>
    %26 = vector.broadcast %25 : vector<1x32xf32> to vector<8x32xf32>
    %27 = arith.addf %24, %26 : vector<8x32xf32>
    %cst_14 = arith.constant 0.000000e+00 : f32
    %28 = vector.broadcast %cst_14 : f32 to vector<8x32xf32>
    %29 = arith.cmpf oge, %27, %28 : vector<8x32xf32>
    %cst_15 = arith.constant 2.000000e-01 : f32
    %30 = vector.broadcast %cst_15 : f32 to vector<8x32xf32>
    %31 = arith.mulf %30, %27 : vector<8x32xf32>
    %32 = arith.select %29, %27, %31 : vector<8x32xi1>, vector<8x32xf32>
    %33 = arith.truncf %32 : vector<8x32xf32> to vector<8x32xbf16>
    %c0_16 = arith.constant 0 : index
    %c0_17 = arith.constant 0 : index
    %34 = vector.load %arg6[%c0_16, %c0_17] : memref<32x64xbf16, #tpu.memory_space<vmem>>, vector<32x64xbf16>
    %cst_18 = arith.constant dense<0.000000e+00> : vector<8x64xf32>
    %35 = tpu.matmul %33, %34, %cst_18 {dimension_numbers = #tpu.dot_dimension_numbers<[1], [0], [0], [1], [0, 0, 1, 1], [], []>} : vector<8x32xbf16>, vector<32x64xbf16>, vector<8x64xf32> -> vector<8x64xf32>
    %c0_19 = arith.constant 0 : index
    %c0_20 = arith.constant 0 : index
    %36 = vector.load %arg7[%c0_19, %c0_20] : memref<1x64xf32, #tpu.memory_space<vmem>>, vector<1x64xf32>
    %37 = vector.broadcast %36 : vector<1x64xf32> to vector<8x64xf32>
    %38 = arith.addf %35, %37 : vector<8x64xf32>
    %cst_21 = arith.constant dense<0.000000e+00> : vector<8xf32>
    %39 = vector.multi_reduction <add>, %38, %cst_21 [1] : vector<8x64xf32> to vector<8xf32>
    %40 = vector.shape_cast %39 : vector<8xf32> to vector<8x1xf32>
    %cst_22 = arith.constant 6.400000e+01 : f32
    %41 = vector.broadcast %cst_22 : f32 to vector<8x1xf32>
    %42 = arith.divf %40, %41 : vector<8x1xf32>
    %43 = vector.broadcast %42 : vector<8x1xf32> to vector<8x64xf32>
    %44 = arith.subf %38, %43 : vector<8x64xf32>
    %45 = arith.mulf %44, %44 : vector<8x64xf32>
    %cst_23 = arith.constant dense<0.000000e+00> : vector<8xf32>
    %46 = vector.multi_reduction <add>, %45, %cst_23 [1] : vector<8x64xf32> to vector<8xf32>
    %47 = vector.shape_cast %46 : vector<8xf32> to vector<8x1xf32>
    %cst_24 = arith.constant 6.400000e+01 : f32
    %48 = vector.broadcast %cst_24 : f32 to vector<8x1xf32>
    %49 = arith.divf %47, %48 : vector<8x1xf32>
    %cst_25 = arith.constant 9.99999974E-6 : f32
    %50 = vector.broadcast %cst_25 : f32 to vector<8x1xf32>
    %51 = arith.addf %49, %50 : vector<8x1xf32>
    %52 = math.rsqrt %51 : vector<8x1xf32>
    %53 = vector.broadcast %52 : vector<8x1xf32> to vector<8x64xf32>
    %54 = arith.mulf %44, %53 : vector<8x64xf32>
    %c0_26 = arith.constant 0 : index
    %c0_27 = arith.constant 0 : index
    %55 = vector.load %arg8[%c0_26, %c0_27] : memref<1x64xf32, #tpu.memory_space<vmem>>, vector<1x64xf32>
    %56 = vector.broadcast %55 : vector<1x64xf32> to vector<8x64xf32>
    %57 = arith.mulf %54, %56 : vector<8x64xf32>
    %c0_28 = arith.constant 0 : index
    %c0_29 = arith.constant 0 : index
    %58 = vector.load %arg9[%c0_28, %c0_29] : memref<1x64xf32, #tpu.memory_space<vmem>>, vector<1x64xf32>
    %59 = vector.broadcast %58 : vector<1x64xf32> to vector<8x64xf32>
    %60 = arith.addf %57, %59 : vector<8x64xf32>
    %cst_30 = arith.constant 0.000000e+00 : f32
    %61 = vector.broadcast %cst_30 : f32 to vector<8x64xf32>
    %62 = arith.cmpf oge, %60, %61 : vector<8x64xf32>
    %cst_31 = arith.constant 2.000000e-01 : f32
    %63 = vector.broadcast %cst_31 : f32 to vector<8x64xf32>
    %64 = arith.mulf %63, %60 : vector<8x64xf32>
    %65 = arith.select %62, %60, %64 : vector<8x64xi1>, vector<8x64xf32>
    %66 = arith.truncf %65 : vector<8x64xf32> to vector<8x64xbf16>
    %c0_32 = arith.constant 0 : index
    %c0_33 = arith.constant 0 : index
    %67 = vector.load %arg10[%c0_32, %c0_33] : memref<8x64xbf16, #tpu.memory_space<vmem>>, vector<8x64xbf16>
    tpu.vector_store %arg10[%c0_32, %c0_33], %66 {strides = array<i32>} : memref<8x64xbf16, #tpu.memory_space<vmem>>, vector<8x64xbf16>,
    return
  }
  func.func @transform_0(%arg0: i32) -> (i32, i32) {
    %c0_i32 = arith.constant 0 : i32
    %c0_i32_0 = arith.constant 0 : i32
    return %arg0, %c0_i32 : i32, i32
  }
  func.func @transform_1(%arg0: i32) -> (i32, i32) {
    %c0_i32 = arith.constant 0 : i32
    %c0_i32_0 = arith.constant 0 : i32
    %c0_i32_1 = arith.constant 0 : i32
    return %c0_i32, %c0_i32_0 : i32, i32
  }
  func.func @transform_2(%arg0: i32) -> (i32, i32) {
    %c0_i32 = arith.constant 0 : i32
    %c0_i32_0 = arith.constant 0 : i32
    %c0_i32_1 = arith.constant 0 : i32
    return %c0_i32, %c0_i32_0 : i32, i32
  }
  func.func @transform_3(%arg0: i32) -> (i32, i32) {
    %c0_i32 = arith.constant 0 : i32
    %c0_i32_0 = arith.constant 0 : i32
    %c0_i32_1 = arith.constant 0 : i32
    return %c0_i32, %c0_i32_0 : i32, i32
  }
  func.func @transform_4(%arg0: i32) -> (i32, i32) {
    %c0_i32 = arith.constant 0 : i32
    %c0_i32_0 = arith.constant 0 : i32
    %c0_i32_1 = arith.constant 0 : i32
    return %c0_i32, %c0_i32_0 : i32, i32
  }
  func.func @transform_5(%arg0: i32) -> (i32, i32) {
    %c0_i32 = arith.constant 0 : i32
    %c0_i32_0 = arith.constant 0 : i32
    %c0_i32_1 = arith.constant 0 : i32
    return %c0_i32, %c0_i32_0 : i32, i32
  }
  func.func @transform_6(%arg0: i32) -> (i32, i32) {
    %c0_i32 = arith.constant 0 : i32
    %c0_i32_0 = arith.constant 0 : i32
    %c0_i32_1 = arith.constant 0 : i32
    return %c0_i32, %c0_i32_0 : i32, i32
  }
  func.func @transform_7(%arg0: i32) -> (i32, i32) {
    %c0_i32 = arith.constant 0 : i32
    %c0_i32_0 = arith.constant 0 : i32
    %c0_i32_1 = arith.constant 0 : i32
    return %c0_i32, %c0_i32_0 : i32, i32
  }
  func.func @transform_8(%arg0: i32) -> (i32, i32) {
    %c0_i32 = arith.constant 0 : i32
    %c0_i32_0 = arith.constant 0 : i32
    %c0_i32_1 = arith.constant 0 : i32
    return %c0_i32, %c0_i32_0 : i32, i32
  }
  func.func @transform_9(%arg0: i32) -> (i32, i32) {
    %c0_i32 = arith.constant 0 : i32
    %c0_i32_0 = arith.constant 0 : i32
    return %arg0, %c0_i32 : i32, i32
  }
}

</mosaic_0001>

<bundles_post_ra>
// kernel: condition_decoder_forward.1
= control target key start
LH: loop header
LB: loop body
LE: loop exit
PB: predicated region body
PF: predicated region fallthrough
CT: control target
= control target key end

     0   :  { %14 = vsyncpa [#allocation3], 0  ;;  %s487_s0 = inlined_call_operand.hbm [shape: bf16[8,16], index: 0, kind: input, shape index: {}]   ;;  %s488_s1 = inlined_call_operand.hbm [shape: bf16[16,32], index: 1, kind: input, shape index: {}]   ;;  %s489_s2 = inlined_call_operand.vmem [shape: f32[1,32], index: 2, kind: input, shape index: {}]   ;;  %s490_s3 = inlined_call_operand.vmem [shape: f32[1,32], index: 3, kind: input, shape index: {}]   ;;  %s491_s4 = inlined_call_operand.vmem [shape: f32[1,32], index: 4, kind: input, shape index: {}]   ;;  %s492_s5 = inlined_call_operand.hbm [shape: bf16[32,64], index: 5, kind: input, shape index: {}]   ;;  %s493_s6 = inlined_call_operand.vmem [shape: f32[1,64], index: 6, kind: input, shape index: {}]   ;;  %s494_s7 = inlined_call_operand.vmem [shape: f32[1,64], index: 7, kind: input, shape index: {}]   ;;  %s495_s8 = inlined_call_operand.vmem [shape: f32[1,64], index: 8, kind: input, shape index: {}]   ;;  %s496_s9 = inlined_call_operand.hbm [shape: bf16[8,64], index: 9, kind: output, shape index: {}]  }
   0x1   :  { %15 = vsyncpa [#allocation6], 0  ;;  %s32_s11 = sshll.u32 %s488_s1, 4  ;;  %s33_s11 = int_to_ptr.hbm [resolvable:$true] %s32_s11 }
   0x2   :  { %16 = vsyncpa [#allocation4], 0  ;;  %s394_s12 = smov [#allocation5]   ;;  %s22_s16 = sshll.u32 %s487_s0, 4  ;;  %s23_s16 = int_to_ptr.hbm [resolvable:$true] %s22_s16 }
   0x3   :  { %s34_s13 = sshll.u32 %s394_s12, 4  ;;  %s395_s17 = smov 64   ;;  %s35_s13 = int_to_ptr.vmem [resolvable:$true] %s34_s13 }
   0x4   :  { %s396_s18 = smov 4   ;;  %s397_s19 = smov [#allocation2]  }
   0x5   :  { %40 = dma.hbm_to_vmem [thread:$0]  %s33_s11, 128, %s35_s13, [#allocation6], %s395_s17, %s395_s17, %s396_s18  }
   0x6   :  { %s24_s20 = sshll.u32 %s397_s19, 4  ;;  %s51_s23 = sshll.u32 %s492_s5, 4  ;;  %s25_s20 = int_to_ptr.vmem [resolvable:$true] %s24_s20  ;;  %s52_s23 = int_to_ptr.hbm [resolvable:$true] %s51_s23 }
   0x7   :  { %27 = dma.hbm_to_vmem [thread:$0]  %s23_s16, 64, %s25_s20, [#allocation3]  }
   0x8   :  { %s398_s1 = smov [#allocation7]  }
   0x9   :  { %s53_s24 = sshll.u32 %s398_s1, 4  ;;  %s54_s24 = int_to_ptr.vmem [resolvable:$true] %s53_s24 }
   0xa   :  { %59 = dma.hbm_to_vmem [thread:$0]  %s52_s23, 256, %s54_s24, [#allocation6], %s395_s17, %s395_s17, %s396_s18  }
   0xb   :  { %388 = dma.done.wait [#allocation3], 64  }
   0xc   :  { %389 = vsyncadd [#allocation3], 4294967232 }
   0xd   :  { %390 = dma.done.wait [#allocation6], 384  }
   0xe   :  { %391 = vsyncadd [#allocation6], 4294966912  ;;  %v267_v0 = vld [vmem:[#allocation5] sm:$0xff]  ;;  %vm92_vm0 = vcmask 130048   ;;  %v79_v1 = vld [vmem:[#allocation2] sm:$0xf] }
   0xf   :  { %103 = vmatpush.bf16.msra.mxu0 %v267_v0  ;;  %v278_v2 = vld [vmem:[%s489_s2] ss:$0 sm:$0xff]  ;;  %vm109_vm1 = vcmask 261120   ;;  %v399_v7 = vmov 32.0   ;;  %v269_v19 = vld [vmem:[#allocation7 + $0x8] sm:$0xff]  ;;  %v268_v20 = vld [vmem:[#allocation7] sm:$0xff] }
  0x10   :  { %284 = vrcp.f32 %v399_v7  ;;  %182 = vmatpush.bf16.msra.mxu1 %v269_v19  ;;  %v279_v30 = vld [vmem:[%s490_s3] ss:$0 sm:$0xff]  ;;  %vm189_vm7 = vcmask 523264   ;;  %v400_v44 = vmov 64.0   ;;  %s401_s10 = smov [#allocation8]   ;;  %s242_s14 = sshll.u32 %s496_s9, 4  ;;  %s243_s14 = int_to_ptr.hbm [resolvable:$true] %s242_s14 }
  0x11   :  { %v280_v33 = vld [vmem:[%s491_s4] ss:$0 sm:$0xff]  ;;  %s240_s11 = sshll.u32 %s401_s10, 4  ;;  %vm233_vm13 = vcmask 519168   ;;  %s241_s11 = int_to_ptr.vmem [resolvable:$true] %s240_s11 }
  0x12   :  { %257 = vmatmul.msk.bf16.vlgmr.msra.gmra.mxu0 %vm92_vm0, %v79_v1  ;;  %v281_v39 = vld [vmem:[%s493_s6] ss:$0 sm:$0xff] }
  0x13   :  { %v282_v1 = vld [vmem:[%s494_s7] ss:$0 sm:$0xff] }
  0x14   :  { %183 = vmatpush.bf16.msra.mxu1 %v268_v20 }
  0x16   :  { %v285_v8 = vpop.eup %284 }
  0x17   :  { %v114_v9 = vmul.f32 32.0, %v285_v8  ;;  %vm118_vm2 = vweird.f32 %v285_v8 }
  0x19   :  { %v115_v10 = vsub.f32 1.0, %v114_v9 }
  0x1b   :  { %v116_v11 = vmul.f32 %v285_v8, %v115_v10 }
  0x1d   :  { %v117_v12 = vadd.f32 %v285_v8, %v116_v11 }
  0x1f   :  { %v119_v13 = vsel %vm118_vm2, %v285_v8, %v117_v12 }
  0x8f   :  { %v105_v3 = vpop.f32.mrf.mxu0 }
  0x90   :  { %v106_v4 = vadd.f32 %v278_v2, %v105_v3 }
  0x92   :  { %v110_v5 = vsel %vm109_vm1, %v106_v4, 0.0 }
  0x93   :  { %111 = vadd.xlane.f32.xlu0 %v110_v5 }
  0x97   :  { %v107_v6 = vpop.f32.mrf.mxu0 }
 0x106   :  { %v112_v14 = vpop.xlane.xlu0 %111 }
 0x107   :  { %v120_v15 = vmul.f32 %v119_v13, %v112_v14 }
 0x109   :  { %v121_v16 = vsub.f32 %v106_v4, %v120_v15  ;;  %v283_v4 = vld [vmem:[%s495_s8] ss:$0 sm:$0xff] }
 0x10b   :  { %v122_v17 = vmul.f32 %v121_v16, %v121_v16 }
 0x10d   :  { %v123_v18 = vsel %vm109_vm1, %v122_v17, 0.0 }
 0x10e   :  { %124 = vadd.xlane.f32.xlu0 %v123_v18 }
 0x181   :  { %v125_v21 = vpop.xlane.xlu0 %124 }
 0x182   :  { %v126_v22 = vmul.f32 %v125_v21, %v119_v13 }
 0x184   :  { %v127_v23 = vadd.f32 1e-05, %v126_v22 }
 0x186   :  { %286 = vrsqrt.f32 %v127_v23  ;;  %vm134_vm4 = vweird.f32 %v127_v23 }
 0x187   :  { %288 = vrcp.f32 %v400_v44 }
 0x18c   :  { %v287_v24 = vpop.eup %286 }
 0x18d   :  { %v129_v25 = vmul.f32 %v287_v24, %v127_v23  ;;  %vm135_vm3 = vweird.f32 %v287_v24  ;;  %v289_v45 = vpop.eup %288 }
 0x18e   :  { %vm136_vm5 = vmor %vm134_vm4, %vm135_vm3  ;;  %v194_v46 = vmul.f32 64.0, %v289_v45  ;;  %vm198_vm8 = vweird.f32 %v289_v45 }
 0x18f   :  { %v130_v26 = vmul.f32 %v287_v24, %v129_v25 }
 0x190   :  { %v195_v47 = vsub.f32 1.0, %v194_v46 }
 0x191   :  { %v131_v27 = vmul.f32 0.5, %v130_v26 }
 0x192   :  { %v196_v48 = vmul.f32 %v289_v45, %v195_v47 }
 0x193   :  { %v132_v28 = vsub.f32 1.5, %v131_v27 }
 0x194   :  { %v197_v49 = vadd.f32 %v289_v45, %v196_v48 }
 0x195   :  { %v133_v29 = vmul.f32 %v287_v24, %v132_v28 }
 0x196   :  { %v199_v50 = vsel %vm198_vm8, %v289_v45, %v197_v49 }
 0x197   :  { %v137_v31 = vsel %vm136_vm5, %v287_v24, %v133_v29 }
 0x198   :  { %v138_v32 = vmul.f32 %v137_v31, %v121_v16 }
 0x19a   :  { %v143_v34 = vmul.f32 %v279_v30, %v138_v32 }
 0x19c   :  { %v148_v35 = vadd.f32 %v280_v33, %v143_v34 }
 0x19e   :  { %vm149_vm6 = vcmp.ge.f32.partialorder %v148_v35, 0.0  ;;  %v150_v36 = vmul.f32 0.2, %v148_v35 }
 0x1a0   :  { %v151_v37 = vsel %vm149_vm6, %v148_v35, %v150_v36 }
 0x1a1   :  { %v152_v38 = vpack.c.bf16 %v151_v37, %v151_v37 }
 0x1a3   :  { %266 = vmatmul.msk.bf16.vlgmr.msra.gmra.mxu1 %vm109_vm1, %v152_v38 }
 0x220   :  { %v185_v40 = vpop.f32.mrf.mxu1 }
 0x221   :  { %v186_v41 = vadd.f32 %v281_v39, %v185_v40 }
 0x223   :  { %v190_v42 = vsel %vm189_vm7, %v186_v41, 0.0 }
 0x224   :  { %191 = vadd.xlane.f32.xlu1 %v190_v42 }
 0x228   :  { %v187_v43 = vpop.f32.mrf.mxu1 }
 0x297   :  { %v192_v51 = vpop.xlane.xlu1 %191 }
 0x298   :  { %v200_v52 = vmul.f32 %v199_v50, %v192_v51 }
 0x29a   :  { %v201_v53 = vsub.f32 %v186_v41, %v200_v52 }
 0x29c   :  { %v202_v54 = vmul.f32 %v201_v53, %v201_v53 }
 0x29e   :  { %v203_v55 = vsel %vm189_vm7, %v202_v54, 0.0 }
 0x29f   :  { %204 = vadd.xlane.f32.xlu1 %v203_v55 }
 0x312   :  { %v205_v56 = vpop.xlane.xlu1 %204 }
 0x313   :  { %v206_v57 = vmul.f32 %v205_v56, %v199_v50 }
 0x315   :  { %v207_v58 = vadd.f32 1e-05, %v206_v57 }
 0x317   :  { %290 = vrsqrt.f32 %v207_v58  ;;  %vm214_vm10 = vweird.f32 %v207_v58 }
 0x31d   :  { %v291_v59 = vpop.eup %290 }
 0x31e   :  { %v209_v60 = vmul.f32 %v291_v59, %v207_v58  ;;  %vm215_vm9 = vweird.f32 %v291_v59 }
 0x31f   :  { %vm216_vm11 = vmor %vm214_vm10, %vm215_vm9 }
 0x320   :  { %v210_v61 = vmul.f32 %v291_v59, %v209_v60 }
 0x322   :  { %v211_v62 = vmul.f32 0.5, %v210_v61 }
 0x324   :  { %v212_v63 = vsub.f32 1.5, %v211_v62 }
 0x326   :  { %v213_v0 = vmul.f32 %v291_v59, %v212_v63 }
 0x328   :  { %v217_v2 = vsel %vm216_vm11, %v291_v59, %v213_v0 }
 0x329   :  { %v218_v3 = vmul.f32 %v217_v2, %v201_v53 }
 0x32b   :  { %v223_v5 = vmul.f32 %v282_v1, %v218_v3 }
 0x32d   :  { %v228_v6 = vadd.f32 %v283_v4, %v223_v5 }
 0x32f   :  { %vm229_vm12 = vcmp.ge.f32.partialorder %v228_v6, 0.0  ;;  %v230_v7 = vmul.f32 0.2, %v228_v6 }
 0x331   :  { %v231_v8 = vsel %vm229_vm12, %v228_v6, %v230_v7 }
 0x332   :  { %v232_v9 = vpack.c.bf16 %v231_v8, %v231_v8 }
 0x334   :  { %234 = vst.msk [vmem:[#allocation8] sm:$0xf] %vm233_vm13, %v232_v9 }
 0x335   :  { %245 = dma.vmem_to_hbm [thread:$0]  %s241_s11, 64, %s243_s14, [#allocation4]  }
 0x336   :  { %392 = dma.done.wait [#allocation4], 64  }
 0x337   :  { %393 = vsyncadd [#allocation4], 4294967232 }
 0x338   :  { %250 = vsyncpa [#allocation3], 1 }
 0x339   :  { %251 = vsyncpa [#allocation6], 1 }
 0x33a   :  { %252 = vsyncpa [#allocation4], 1 }

</bundles_post_ra>
